<compile_context>
chip_gen: v7x
topology: tpu7x:2x2x1
jax: 0.10.0
libtpu: 0.0.40
codegen_flags: <defaults>
</compile_context>

<pallas_src>
import functools

import jax
import jax.numpy as jnp
import numpy as np
from jax import lax
from jax.experimental import pallas as pl
from jax.experimental.pallas import tpu as pltpu

_LOG2E = float(np.log2(np.e))


# ---------------------------------------------------------------------------
# Kernel 1: fused K/V projection (Q is produced inside the attention kernel)
# ---------------------------------------------------------------------------
def _kv_proj_kernel(x_ref, w_ref, k_ref, v_ref, *, d_model):
    """x_ref: (1, TS, D) f32; w_ref: (D, 2D) bf16 = [Wk|Wv]^T;
    outputs k_ref/v_ref: (1, TS, D) bf16."""
    x = x_ref[0].astype(jnp.bfloat16)                               # cast in-kernel
    y = jnp.dot(x, w_ref[...], preferred_element_type=jnp.float32)  # (TS, 2D) f32
    k_ref[0] = y[:, :d_model].astype(k_ref.dtype)
    v_ref[0] = y[:, d_model:].astype(v_ref.dtype)


# ---------------------------------------------------------------------------
# Kernel 2: flash-style attention (+ fused Q projection + output projection)
# ---------------------------------------------------------------------------
def _attn_kernel(xq_ref, wq_ref, k_ref, v_ref, wo_ref, o_ref,
                 q_sc, m_sc, l_sc, acc_sc, *, num_heads, d_head, scale):
    """xq_ref: (1, TQ, D) f32 (the x q-tile); wq_ref/wo_ref: (D, D) bf16;
    k_ref/v_ref: (1, TK, D) bf16.
    Scratch: q_sc (TQ, D) bf16 (scaled Q, includes log2(e)),
             m_sc/l_sc (H, TQ, 1) f32, acc_sc (TQ, D) f32 (unnormalized)."""
    ki = pl.program_id(2)

    @pl.when(ki == 0)
    def _init():
        # Fold the Q projection into this pass: one (TQ,D)@(D,D) matmul per
        # q-tile, scale (1/sqrt(d_head) * log2(e)) applied once here.
        xq = xq_ref[0].astype(jnp.bfloat16)
        q_f32 = jnp.dot(xq, wq_ref[...], preferred_element_type=jnp.float32)
        q_sc[...] = (q_f32 * scale).astype(jnp.bfloat16)
        m_sc[...] = jnp.full_like(m_sc, -jnp.inf)
        l_sc[...] = jnp.zeros_like(l_sc)
        acc_sc[...] = jnp.zeros_like(acc_sc)

    q = q_sc[...]                                                   # (TQ, D) bf16
    k = k_ref[0]                                                    # (TK, D) bf16
    v = v_ref[0]                                                    # (TK, D) bf16
    tq = q.shape[0]

    # Static head loop (H is small here).  If H >= 8 and the bundle dump shows
    # spills, switch to lax.fori_loop(..., unroll=2) with pl.ds head slices.
    pv_blocks = []
    alpha_blocks = []
    for h in range(num_heads):
        lo = h * d_head
        qh = q[:, lo:lo + d_head]
        kh = k[:, lo:lo + d_head]
        vh = v[:, lo:lo + d_head]

        # Scores: contract last dims directly (no explicit kh.T / XLU transpose).
        # Q already carries 1/sqrt(d_head) * log2(e)  ->  use exp2 below.
        s = lax.dot_general(qh, kh, (((1,), (1,)), ((), ())),
                            preferred_element_type=jnp.float32)     # (TQ, TK) f32

        m_prev = m_sc[h]                                            # (TQ, 1)
        m_new = jnp.maximum(m_prev, jnp.max(s, axis=-1, keepdims=True))
        alpha = jnp.exp2(m_prev - m_new)                            # (TQ, 1)
        p = jnp.exp2(s - m_new)                                     # (TQ, TK) f32

        l_sc[h] = alpha * l_sc[h] + jnp.sum(p, axis=-1, keepdims=True)
        m_sc[h] = m_new

        pv = jnp.dot(p.astype(jnp.bfloat16), vh,
                     preferred_element_type=jnp.float32)            # (TQ, dh) f32
        pv_blocks.append(pv)
        alpha_blocks.append(jnp.broadcast_to(alpha, (tq, d_head)))

    # ONE lane-dense (TQ, D) accumulator update per kv step (no per-head
    # masked partial stores on acc_sc).
    pv_full = pv_blocks[0] if num_heads == 1 else jnp.concatenate(pv_blocks, axis=-1)
    alpha_full = (alpha_blocks[0] if num_heads == 1
                  else jnp.concatenate(alpha_blocks, axis=-1))
    acc_sc[...] = alpha_full * acc_sc[...] + pv_full

    @pl.when(ki == pl.num_programs(2) - 1)
    def _finalize():
        # Deferred normalization: EUP reciprocal, one lane-dense multiply.
        inv_blocks = [jnp.broadcast_to(pl.reciprocal(l_sc[h], approx=True),
                                       (tq, d_head))
                      for h in range(num_heads)]
        inv_full = (inv_blocks[0] if num_heads == 1
                    else jnp.concatenate(inv_blocks, axis=-1))
        attn = (acc_sc[...] * inv_full).astype(jnp.bfloat16)        # (TQ, D)
        # Single W_O matmul after the head loop.
        o_ref[0] = jnp.dot(attn, wo_ref[...],
                           preferred_element_type=jnp.float32).astype(o_ref.dtype)


# ---------------------------------------------------------------------------
# Parameter preparation (do the concat / bf16 cast ONCE, not per call)
# ---------------------------------------------------------------------------
def prepare_mhsa_params(wq_t, wk_t, wv_t, wo_t):
    """w*_t: (D, D) f32 pre-transposed nn.Linear weights (y = x @ W_T)."""
    w_q = jnp.asarray(wq_t, jnp.bfloat16)                           # (D, D)
    w_kv = jnp.concatenate([wk_t, wv_t], axis=1).astype(jnp.bfloat16)  # (D, 2D)
    w_o = jnp.asarray(wo_t, jnp.bfloat16)                           # (D, D)
    return w_q, w_kv, w_o


def _clamp_vmem(nbytes):
    # Leave headroom, never below the v6e default, never above ~100 MiB.
    return int(min(max(int(nbytes * 1.3) + (2 << 20), 32 << 20), 100 << 20))


# ---------------------------------------------------------------------------
# Wrapper
# ---------------------------------------------------------------------------
def mh_self_attention(x, params, num_heads, *, tile_s=512, tile_q=256,
                      tile_k=256, out_dtype=jnp.float32):
    """x: (B, S, D) f32; params = prepare_mhsa_params(wq_t, wk_t, wv_t, wo_t).

    out_dtype=jnp.bfloat16 halves the output writeback when downstream
    tolerates it."""
    w_q, w_kv, w_o = params
    B, S, D = x.shape
    assert D % num_heads == 0
    d_head = D // num_heads
    # 1/sqrt(d_head) and log2(e) folded into Q (kernel uses exp2).
    scale = float(_LOG2E / np.sqrt(d_head))

    TS = S if S < tile_s else tile_s
    TQ = S if S < tile_q else tile_q
    TK = S if S < tile_k else tile_k
    assert S % TS == 0 and S % TQ == 0 and S % TK == 0

    # ---- pass 1: fused K/V projection -------------------------------------
    vmem1 = _clamp_vmem(2 * TS * D * 4            # x tile (f32, double-buffered)
                        + 2 * D * 2 * D * 2       # resident [Wk|Wv]^T (bf16)
                        + 2 * 2 * TS * D * 2)     # K, V output tiles (bf16)
    kv_kernel = functools.partial(_kv_proj_kernel, d_model=D)
    k, v = pl.pallas_call(
        kv_kernel,
        out_shape=(jax.ShapeDtypeStruct((B, S, D), jnp.bfloat16),) * 2,
        grid=(B, S // TS),
        in_specs=[
            pl.BlockSpec((1, TS, D), lambda b, s: (b, s, 0)),       # x (f32)
            pl.BlockSpec((D, 2 * D), lambda b, s: (0, 0)),          # [Wk|Wv]^T
        ],
        out_specs=(pl.BlockSpec((1, TS, D), lambda b, s: (b, s, 0)),) * 2,
        compiler_params=pltpu.CompilerParams(
            dimension_semantics=("parallel", "parallel"),
            vmem_limit_bytes=vmem1),
    )(x, w_kv)

    # ---- pass 2: Q projection + attention + output projection -------------
    out_itemsize = jnp.dtype(out_dtype).itemsize
    vmem2 = _clamp_vmem(2 * TQ * D * 4            # x q-tile (f32)
                        + 2 * D * D * 2           # resident W_Q^T
                        + 2 * 2 * TK * D * 2      # K, V tiles
                        + 2 * D * D * 2           # resident W_O^T
                        + 2 * TQ * D * out_itemsize  # output tile
                        + TQ * D * 2              # q_sc (bf16)
                        + 2 * num_heads * max(TQ, 8) * 128 * 4  # m_sc, l_sc (lane-padded)
                        + TQ * D * 4)             # acc_sc (f32)
    attn_kernel = functools.partial(_attn_kernel, num_heads=num_heads,
                                    d_head=d_head, scale=scale)
    out = pl.pallas_call(
        attn_kernel,
        out_shape=jax.ShapeDtypeStruct((B, S, D), out_dtype),
        grid=(B, S // TQ, S // TK),
        in_specs=[
            pl.BlockSpec((1, TQ, D), lambda b, qi, ki: (b, qi, 0)),  # x q-tile
            pl.BlockSpec((D, D), lambda b, qi, ki: (0, 0)),          # W_Q^T
            pl.BlockSpec((1, TK, D), lambda b, qi, ki: (b, ki, 0)),  # K tile
            pl.BlockSpec((1, TK, D), lambda b, qi, ki: (b, ki, 0)),  # V tile
            pl.BlockSpec((D, D), lambda b, qi, ki: (0, 0)),          # W_O^T
        ],
        out_specs=pl.BlockSpec((1, TQ, D), lambda b, qi, ki: (b, qi, 0)),
        scratch_shapes=[
            pltpu.VMEM((TQ, D), jnp.bfloat16),             # scaled Q tile
            pltpu.VMEM((num_heads, TQ, 1), jnp.float32),   # running max
            pltpu.VMEM((num_heads, TQ, 1), jnp.float32),   # running denom
            pltpu.VMEM((TQ, D), jnp.float32),              # unnormalized attn out
        ],
        compiler_params=pltpu.CompilerParams(
            dimension_semantics=("parallel", "parallel", "arbitrary"),
            vmem_limit_bytes=vmem2),
    )(x, w_q, k, v, w_o)
    return out


# ---------------------------------------------------------------------------
# Pure-JAX reference (replicates the PyTorch forward; mask is a no-op there)
# ---------------------------------------------------------------------------
def _reference(x, wq_t, wk_t, wv_t, wo_t, num_heads):
    B, S, D = x.shape
    dh = D // num_heads
    q = x @ wq_t
    k = x @ wk_t
    v = x @ wv_t

    def split(t):
        return t.reshape(B, S, num_heads, dh).transpose(0, 2, 1, 3)

    qh, kh, vh = split(q), split(k), split(v)                       # (B, H, S, dh)
    scores = jnp.einsum('bhqd,bhkd->bhqk', qh, kh) / jnp.sqrt(jnp.float32(dh))
    w = jax.nn.softmax(scores, axis=-1)
    out = jnp.einsum('bhqk,bhkd->bhqd', w, vh)                      # (B, H, S, dh)
    out = out.transpose(0, 2, 1, 3).reshape(B, S, D)
    return out @ wo_t


if __name__ == "__main__":
    B, S, D, H = 2, 8, 32, 4

    key = jax.random.PRNGKey(0)
    kx, kq, kk, kv, ko = jax.random.split(key, 5)

    # nn.Linear-style uniform(-1/sqrt(D), 1/sqrt(D)) params, stored pre-transposed
    # so that y = x @ W_T == nn.Linear(x).
    bound = 1.0 / np.sqrt(D)
    x = jax.random.normal(kx, (B, S, D), dtype=jnp.float32)
    wq_t = jax.random.uniform(kq, (D, D), jnp.float32, -bound, bound)
    wk_t = jax.random.uniform(kk, (D, D), jnp.float32, -bound, bound)
    wv_t = jax.random.uniform(kv, (D, D), jnp.float32, -bound, bound)
    wo_t = jax.random.uniform(ko, (D, D), jnp.float32, -bound, bound)

    params = prepare_mhsa_params(wq_t, wk_t, wv_t, wo_t)   # one-time cast/concat
    out = mh_self_attention(x, params, num_heads=H)
    out = jax.block_until_ready(out)

    ref = _reference(x, wq_t, wk_t, wv_t, wo_t, num_heads=H)
    assert out.shape == (B, S, D)
    # bf16 MXU operands (f32 accumulation / softmax) -> loosened tolerance.
    np.testing.assert_allclose(np.asarray(out), np.asarray(ref),
                               rtol=3e-2, atol=3e-2)
    print("KERNEL_OK")
</pallas_src>

<mosaic_0001>
module attributes {stable_mosaic.version = 11 : i64} {
  func.func @_kv_proj_kernel(%arg0: i32, %arg1: i32, %arg2: memref<1x8x32xf32, #tpu.memory_space<vmem>>, %arg3: memref<32x64xbf16, #tpu.memory_space<vmem>>, %arg4: memref<1x8x32xbf16, #tpu.memory_space<vmem>>, %arg5: memref<1x8x32xbf16, #tpu.memory_space<vmem>>) attributes {dimension_semantics = [#tpu.dimension_semantics<parallel>, #tpu.dimension_semantics<parallel>], iteration_bounds = array<i64: 2, 1>, scalar_prefetch = 0 : i64, scratch_operands = 0 : i64, tpu.core_type = #tpu.core_type<tc>, window_params = [{transform_indices = @transform_0, window_bounds = array<i64: 1, 8, 32>}, {pipeline_mode = #tpu.pipeline_mode<synchronous>, transform_indices = @transform_1, window_bounds = array<i64: 32, 64>}, {transform_indices = @transform_2, window_bounds = array<i64: 1, 8, 32>}, {transform_indices = @transform_3, window_bounds = array<i64: 1, 8, 32>}]} {
    %c0 = arith.constant 0 : index
    %c0_0 = arith.constant 0 : index
    %c0_1 = arith.constant 0 : index
    %0 = vector.load %arg2[%c0, %c0_0, %c0_1] : memref<1x8x32xf32, #tpu.memory_space<vmem>>, vector<1x8x32xf32>
    %1 = vector.shape_cast %0 : vector<1x8x32xf32> to vector<8x32xf32>
    %2 = arith.truncf %1 : vector<8x32xf32> to vector<8x32xbf16>
    %c0_2 = arith.constant 0 : index
    %c0_3 = arith.constant 0 : index
    %3 = vector.load %arg3[%c0_2, %c0_3] : memref<32x64xbf16, #tpu.memory_space<vmem>>, vector<32x64xbf16>
    %cst = arith.constant dense<0.000000e+00> : vector<8x64xf32>
    %4 = tpu.matmul %2, %3, %cst {dimension_numbers = #tpu.dot_dimension_numbers<[1], [0], [0], [1], [0, 0, 1, 1], [], []>} : vector<8x32xbf16>, vector<32x64xbf16>, vector<8x64xf32> -> vector<8x64xf32>
    %5 = vector.extract_strided_slice %4 {offsets = [0, 0], sizes = [8, 32], strides = [1, 1]} : vector<8x64xf32> to vector<8x32xf32>
    %6 = arith.truncf %5 : vector<8x32xf32> to vector<8x32xbf16>
    %c0_4 = arith.constant 0 : index
    %c0_5 = arith.constant 0 : index
    %c0_6 = arith.constant 0 : index
    %7 = vector.load %arg4[%c0_4, %c0_5, %c0_6] : memref<1x8x32xbf16, #tpu.memory_space<vmem>>, vector<1x8x32xbf16>
    %8 = vector.shape_cast %7 : vector<1x8x32xbf16> to vector<8x32xbf16>
    %9 = vector.shape_cast %6 : vector<8x32xbf16> to vector<1x8x32xbf16>
    tpu.vector_store %arg4[%c0_4, %c0_5, %c0_6], %9 {strides = array<i32>} : memref<1x8x32xbf16, #tpu.memory_space<vmem>>, vector<1x8x32xbf16>,
    %10 = vector.extract_strided_slice %4 {offsets = [0, 32], sizes = [8, 32], strides = [1, 1]} : vector<8x64xf32> to vector<8x32xf32>
    %11 = arith.truncf %10 : vector<8x32xf32> to vector<8x32xbf16>
    %c0_7 = arith.constant 0 : index
    %c0_8 = arith.constant 0 : index
    %c0_9 = arith.constant 0 : index
    %12 = vector.load %arg5[%c0_7, %c0_8, %c0_9] : memref<1x8x32xbf16, #tpu.memory_space<vmem>>, vector<1x8x32xbf16>
    %13 = vector.shape_cast %12 : vector<1x8x32xbf16> to vector<8x32xbf16>
    %14 = vector.shape_cast %11 : vector<8x32xbf16> to vector<1x8x32xbf16>
    tpu.vector_store %arg5[%c0_7, %c0_8, %c0_9], %14 {strides = array<i32>} : memref<1x8x32xbf16, #tpu.memory_space<vmem>>, vector<1x8x32xbf16>,
    return
  }
  func.func @transform_0(%arg0: i32, %arg1: i32) -> (i32, i32, i32) {
    %c0_i32 = arith.constant 0 : i32
    %c0_i32_0 = arith.constant 0 : i32
    return %arg0, %arg1, %c0_i32 : i32, i32, i32
  }
  func.func @transform_1(%arg0: i32, %arg1: i32) -> (i32, i32) {
    %c0_i32 = arith.constant 0 : i32
    %c0_i32_0 = arith.constant 0 : i32
    %c0_i32_1 = arith.constant 0 : i32
    return %c0_i32, %c0_i32_0 : i32, i32
  }
  func.func @transform_2(%arg0: i32, %arg1: i32) -> (i32, i32, i32) {
    %c0_i32 = arith.constant 0 : i32
    %c0_i32_0 = arith.constant 0 : i32
    return %arg0, %arg1, %c0_i32 : i32, i32, i32
  }
  func.func @transform_3(%arg0: i32, %arg1: i32) -> (i32, i32, i32) {
    %c0_i32 = arith.constant 0 : i32
    %c0_i32_0 = arith.constant 0 : i32
    return %arg0, %arg1, %c0_i32 : i32, i32, i32
  }
}

</mosaic_0001>

<bundles_post_ra>
// kernel: tpu_custom_call.1
= control target key start
LH: loop header
LB: loop body
LE: loop exit
PB: predicated region body
PF: predicated region fallthrough
CT: control target
= control target key end

     0   :  { %9 = vsyncpa [#allocation3], 0  ;;  %s1041_s0 = inlined_call_operand.hbm [shape: f32[2,8,32], index: 0, kind: input, shape index: {}]   ;;  %s1042_s1 = inlined_call_operand.hbm [shape: bf16[32,64], index: 1, kind: input, shape index: {}]   ;;  %s1043_s2 = inlined_call_operand.hbm [shape: bf16[2,8,32], index: 2, kind: output, shape index: {0}]   ;;  %s1044_s3 = inlined_call_operand.hbm [shape: bf16[2,8,32], index: 3, kind: output, shape index: {1}]  }
   0x1   :  { %11 = vsyncpa [#allocation3 + $0x1], 0 }
   0x2   :  { %12 = vsyncpa [#allocation6], 0 }
   0x3   :  { %13 = vsyncpa [#allocation4], 0 }
   0x4   :  { %15 = vsyncpa [#allocation4 + $0x1], 0 }
   0x5   :  { %16 = vsyncpa [#allocation9], 0 }
   0x6   :  { %18 = vsyncpa [#allocation9 + $0x1], 0  ;;  %s787_s12 = smov 0   ;;  %s789_s13 = smov 0  }
   0x7   :  { %s791_s14 = smov 0   ;;  %s793_s15 = smov 0  }
   0x8   :  { %s795_s16 = smov 0   ;;  %s797_s17 = smov 0  }
   0x9 LB: > { %s461_s18 = sadd.s32 4294967295, %s756_s17   ;;  %s462_s19 = sadd.s32 4294967294, %s756_s17   ;;  %s756_s17 = sphi %s797_s17, %s24_s17   ;;  %s752_s16 = sphi %s795_s16, %s1068_s16   ;;  %s748_s15 = sphi %s793_s15, %s1067_s15   ;;  %s744_s14 = sphi %s791_s14, %s1066_s14   ;;  %s740_s13 = sphi %s789_s13, %s1065_s13   ;;  %s736_s12 = sphi %s787_s12, %s1064_s12  }
   0xa   : > { %p58_p0 = scmp.ne.s32.totalorder %s740_s13, %s736_s12  ;;  %p821_p1 = scmp.eq.s32.totalorder %s461_s18, 0 }
   0xb   : > { %p825_p2 = scmp.eq.s32.totalorder %s461_s18, 1  ;;  %p111_p3 = scmp.eq.s32.totalorder %s462_s19, 1 }
   0xc   : > { %s1049_s20 = scalar_select %p821_p1, 1, 0 }
   0xd   : > { %s1050_s21 = scalar_select %p825_p2, 1, 0 }
   0xe   : > { %p831_p4 = por %p821_p1, %p58_p0  ;;  %p463_p5 = scmp.ge.s32.totalorder %s756_s17, 1 }
   0xf   : > { %p836_p6 = por %p111_p3, %p58_p0  ;;  %p146_p7 = scmp.lt.s32.totalorder %s756_s17, 3 }
  0x10   : > { %s1051_s22 = scalar_select %p831_p4, 1, 0 }
  0x11   : > { %s1052_s23 = scalar_select %p836_p6, 1, 0 }
  0x12   : > { %p841_p8 = pnand %p463_p5, %p146_p7  ;;  %s758_s25 = smov [#allocation5]  }
  0x13   : > { %s158_s26 = sshll.u32 %s758_s25, 4  ;;  %s36_s28 = sadd.s32 1, %s752_s16  ;;  %s159_s26 = int_to_ptr.vmem [resolvable:$true] %s158_s26 }
  0x14   : > { %s1053_s24 = scalar_select %p841_p8, 1, 0 }
  0x15   : > { %p505_p9 = pneg %p841_p8  ;;  %s580_s4 = scalar_lea.hbm %s1042_s1, 256 }
  0x16   : > { %p581_p12 = scmp.ne.s32.totalorder %s1042_s1, %s580_s4  ;;  %p587_p5 = scmp.lt.u32.totalorder %s580_s4, %s1042_s1 }
  0x17   : > { %p850_p11 = pnand %p505_p9, %p821_p1 }
  0x19   : > { %p582_p13 = pneg %p850_p11 }
  0x1b   : > { %p583_p0 = pnand %p582_p13, %p581_p12 }
  0x1d   : > { %p584_p3 = pneg %p583_p0 }
  0x1f   : > { %p589_p7 = pnand %p587_p5, %p584_p3 }
  0x21   : > { %592 = shalt.err (!%p589_p7)
}
  0x22   : > { %s593_s9 = scalar_lea.vmem %s159_s26, 256  ;;  %p601_p1 = scmp.lt.s32.totalorder %s159_s26, %s159_s26 }
  0x23   : > { %p594_p9 = scmp.ne.s32.totalorder %s159_s26, %s593_s9  ;;  %p602_p4 = scmp.lt.s32.totalorder %s593_s9, %s593_s9 }
  0x25   : > { %p596_p10 = pnand %p594_p9, %p582_p13  ;;  %p603_p8 = por %p602_p4, %p601_p1 }
  0x27   : > { %p597_p6 = pneg %p596_p10 }
  0x29   : > { %p604_p2 = pnand %p603_p8, %p597_p6 }
  0x2b   : > { %607 = shalt.err (!%p604_p2)
}
  0x2c   : > { %s759_s10 = smov 64   ;;  %s760_s11 = smov 4  }
  0x2d   : > { %508 = dma.hbm_to_vmem [thread:$0]  (!%p850_p11), %s1042_s1, 256, %s159_s26, [#allocation6], %s759_s10, %s759_s10, %s760_s11  }
  0x2e   : > { %p38_p1 = scmp.ge.s32.totalorder %s36_s28, 2  ;;  %s45_s25 = sadd.s32 1, %s744_s14 }
  0x2f   : > { %p52_p2 = scmp.ne.s32.totalorder %s744_s14, %s740_s13  ;;  %p53_p4 = scmp.eq.s32.totalorder %s756_s17, 0 }
  0x30   : > { %s1070_s28 = smov (%p38_p1, %s36_s28), 0  ;;  %p1056_p8 = scmp.ne.s32.totalorder %s1050_s21, 0 }
  0x31   : > { %p877_p6 = por %p53_p4, %p52_p2  ;;  %s40_s27 = ssub.s32 %s752_s16, %s1070_s28 }
  0x32   : > { %p883_p10 = por %p1056_p8, %p52_p2  ;;  %p521_p12 = scmp.lt.s32.totalorder %s756_s17, 2 }
  0x33   : > { %p43_p11 = scmp.eq.s32.totalorder %s40_s27, 0  ;;  %s172_s26 = sand.u32 1, %s744_s14  }
  0x34   : > { %s466_s4 = sshll.u32 %s172_s26, 3  ;;  %s467_s6 = sshll.u32 %s752_s16, 7 }
  0x35   : > { %s892_s5 = scalar_select %p43_p11, %s744_s14, %s45_s25  }
  0x36   : > { %s898_s9 = scalar_lea.hbm %s1041_s0, %s467_s6  ;;  %s176_s21 = scalar_lea.vmem [#allocation2], %s466_s4 }
  0x37   : > { %s184_s10 = sshll.u32 %s176_s21, 4  ;;  %p904_p13 = pnand %p521_p12, %p877_p6  ;;  %s900_s10 = int_to_ptr.vmem [resolvable:$true] %s184_s10 }
  0x38   : > { %s173_s18 = scalar_lea.sflag [#allocation3], %s172_s26  ;;  %s608_s19 = scalar_lea.hbm %s898_s9, 128 }
  0x39   : > { %p609_p0 = scmp.ne.s32.totalorder %s898_s9, %s608_s19  ;;  %p610_p3 = pneg %p904_p13 }
  0x3a   : > { %s613_s4 = scalar_lea.hbm %s1041_s0, 256  ;;  %p614_p9 = scmp.lt.u32.totalorder %s898_s9, %s1041_s0 }
  0x3b   : > { %p611_p5 = pnand %p610_p3, %p609_p0  ;;  %p615_p1 = scmp.lt.u32.totalorder %s613_s4, %s608_s19 }
  0x3c   : > { %p617_p4 = scmp.lt.u32.totalorder %s608_s19, %s898_s9 }
  0x3d   : > { %p612_p7 = pneg %p611_p5  ;;  %p616_p2 = por %p615_p1, %p614_p9 }
  0x3f   : > { %p618_p6 = por %p617_p4, %p616_p2 }
  0x41   : > { %p619_p8 = pnand %p618_p6, %p612_p7 }
  0x43   : > { %622 = shalt.err (!%p619_p8)
}
  0x44   : > { %s623_s26 = scalar_lea.vmem %s900_s10, 128  ;;  %s761_s7 = smov [#allocation2]  }
  0x45   : > { %p624_p12 = scmp.ne.s32.totalorder %s900_s10, %s623_s26  ;;  %s628_s8 = sshll.u32 %s761_s7, 4  ;;  %s629_s8 = int_to_ptr.vmem [resolvable:$false] %s628_s8 }
  0x46   : > { %s630_s21 = scalar_lea.vmem %s629_s8, 256  ;;  %p631_p5 = scmp.lt.s32.totalorder %s900_s10, %s629_s8 }
  0x47   : > { %p626_p11 = pnand %p624_p12, %p610_p3  ;;  %p632_p9 = scmp.lt.s32.totalorder %s630_s21, %s623_s26 }
  0x49   : > { %p627_p0 = pneg %p626_p11  ;;  %p633_p1 = por %p632_p9, %p631_p5 }
  0x4b   : > { %p634_p2 = pnand %p633_p1, %p627_p0 }
  0x4d   : > { %637 = shalt.err (!%p634_p2)
}
  0x4e   : > { %512 = dma.hbm_to_vmem [thread:$0]  (!%p904_p13), %s898_s9, 128, %s900_s10, %s173_s18  }
  0x4f   : > { %p1059_p7 = scmp.ne.s32.totalorder %s1053_s24, 0 }
  0x50   : > { %s936_s19 = sand.u32 (!%p1059_p7), 1, %s740_s13   ;;  %p1060_p3 = scmp.ne.s32.totalorder (!%p1059_p7), %s1051_s22, 0 }
  0x51   : > { %193 = sbr.rel (%p1059_p7) target bundleno = 444 (0x1bc), region = 28  ;;  %s469_s25 = sshll.u32 (!%p1059_p7), %s936_s19, 3 }
  0x52   : > { %s196_s27 = scalar_lea.sflag (!%p1059_p7), [#allocation3], %s936_s19  ;;  %s199_s4 = scalar_lea.vmem (!%p1059_p7), [#allocation2], %s469_s25 }
  0x58   : > { %719 = dma.done.wait (%p1060_p3), %s196_s27, 128  }
  0x59   : > { %721 = vsyncadd (%p1060_p3), %s196_s27, 4294967168  ;;  %p1061_p4 = scmp.ne.s32.totalorder %s1049_s20, 0 }
  0x5b   : > { %723 = dma.done.wait (%p1061_p4), [#allocation6], 256  }
  0x5c   : > { %725 = vsyncadd (%p1061_p4), [#allocation6], 4294967040  ;;  %v762_v0 = vmov 0.0   ;;  %vm763_vm0 = vmmov 0   ;;  %v578_v1 = vld [vmem:[#allocation5] sm:$0xff]   ;;  %v579_v2 = vld [vmem:[#allocation5 + $0x8] sm:$0xff]  }
  0x5d   : > { %487 = vmatprep.subr.bf16.mxu0 %v762_v0  ;;  %491 = vmatprep.mubr.msk.bf16.mxu0 %vm763_vm0, %v762_v0  ;;  %v232_v3 = vld [vmem:[%s199_s4] sm:$0xff]  ;;  %vm250_vm1 = vcmask 261120   ;;  %s471_s20 = sshll.u32 %s936_s19, 2  ;;  %s479_s22 = sshll.u32 %s748_s15, 6  ;;  %vm295_vm2 = vcmask 257024  }
  0x5e   : > { %488 = vmatpush3.bf16.msra.mxu0 %v578_v1  ;;  %v233_v4 = vpack.c.bf16 %v232_v3, %v232_v3  ;;  %s223_s24 = scalar_lea.vmem [#allocation7], %s471_s20  ;;  %s957_s18 = scalar_lea.hbm %s1043_s2, %s479_s22 }
  0x5f   : > { %489 = vmatprep.subr.bf16.mxu0 %v762_v0  ;;  %s324_s9 = sshll.u32 %s223_s24, 4  ;;  %s764_s29 = smov 96   ;;  %s959_s9 = int_to_ptr.vmem [resolvable:$true] %s324_s9 }
  0x60   : > { %s305_s6 = scalar_lea.sflag [#allocation4], %s936_s19  ;;  %s638_s26 = scalar_lea.vmem %s959_s9, 64 }
  0x61   : > { %p639_p13 = scmp.ne.s32.totalorder %s959_s9, %s638_s26  ;;  %s765_s7 = smov [#allocation7]  }
  0x62   : > { %490 = vmatpush3.bf16.msra.mxu0 %v579_v2  ;;  %s642_s8 = sshll.u32 %s765_s7, 4  ;;  %s643_s8 = int_to_ptr.vmem [resolvable:$false] %s642_s8 }
  0x63   : > { %p640_p6 = pnand %p639_p13, %p883_p10  ;;  %s644_s21 = scalar_lea.vmem %s643_s8, 128 }
  0x64   : > { %p645_p12 = scmp.lt.s32.totalorder %s959_s9, %s643_s8  ;;  %p646_p11 = scmp.lt.s32.totalorder %s644_s21, %s638_s26 }
  0x65   : > { %492 = vmatmul.mubr.msk.bf16.vlgmr.msra.gmra.mrb[0].mxu0 %vm250_vm1, %v233_v4  ;;  %p641_p8 = pneg %p640_p6 }
  0x66   : > { %p647_p0 = por %p646_p11, %p645_p12 }
  0x68   : > { %p648_p5 = pnand %p647_p0, %p641_p8 }
 0x138   : > { %v288_v5 = vpop.f32.mrb[0].mxu0 }
 0x139   : > { %v294_v6 = vpack.c.bf16 %v288_v5, %v288_v5  ;;  %v493_v7 = vpop.f32.mrb[1].mxu0 }
 0x13a   : > { %v291_v8 = vpop.f32.mrb[2].mxu0 }
 0x13b   : > { %v494_v9 = vpop.f32.mrb[3].mxu0  ;;  %300 = vrot.lane.b32.xlu0 %v294_v6, %s764_s29  ;;  %296 = vst.msk [vmem:[%s223_s24] sm:$0xf] %vm295_vm2, %v294_v6 }
 0x13c   : > { %651 = shalt.err (!%p648_p5)
}
 0x13d   : > { %s652_s25 = scalar_lea.hbm %s957_s18, 64  ;;  %s656_s24 = scalar_lea.hbm %s1043_s2, 128 }
 0x13e   : > { %p653_p9 = scmp.ne.s32.totalorder %s957_s18, %s652_s25  ;;  %p657_p7 = scmp.lt.u32.totalorder %s957_s18, %s1043_s2 }
 0x13f   : > { %p658_p3 = scmp.lt.u32.totalorder %s656_s24, %s652_s25  ;;  %p660_p13 = scmp.lt.u32.totalorder %s652_s25, %s957_s18 }
 0x140   : > { %p654_p1 = pnand %p653_p9, %p883_p10 }
 0x141   : > { %p659_p4 = por %p658_p3, %p657_p7 }
 0x142   : > { %p655_p2 = pneg %p654_p1 }
 0x143   : > { %p661_p6 = por %p660_p13, %p659_p4 }
 0x145   : > { %p662_p8 = pnand %p661_p6, %p655_p2 }
 0x147   : > { %665 = shalt.err (!%p662_p8)
}
 0x148   : > { %501 = dma.vmem_to_hbm [thread:$0]  (%p883_p10), %s959_s9, 64, %s957_s18, %s305_s6  }
 0x149   : > { %s230_s29 = scalar_lea.vmem [#allocation8], %s471_s20  ;;  %s991_s21 = scalar_lea.hbm %s1044_s3, %s479_s22 }
 0x14a   : > { %s338_s26 = sshll.u32 %s230_s29, 4  ;;  %s310_s25 = scalar_lea.sflag [#allocation9], %s936_s19  ;;  %s993_s26 = int_to_ptr.vmem [resolvable:$true] %s338_s26 }
 0x14b   : > { %s666_s27 = scalar_lea.vmem %s993_s26, 64  ;;  %s766_s15 = smov [#allocation8]  }
 0x14c   : > { %p667_p12 = scmp.ne.s32.totalorder %s993_s26, %s666_s27  ;;  %s670_s20 = sshll.u32 %s766_s15, 4  ;;  %s671_s20 = int_to_ptr.vmem [resolvable:$false] %s670_s20 }
 0x14d   : > { %s672_s9 = scalar_lea.vmem %s671_s20, 128  ;;  %p673_p5 = scmp.lt.s32.totalorder %s993_s26, %s671_s20 }
 0x14e   : > { %p668_p11 = pnand %p667_p12, %p883_p10  ;;  %p674_p9 = scmp.lt.s32.totalorder %s672_s9, %s666_s27 }
 0x150   : > { %p669_p0 = pneg %p668_p11  ;;  %p675_p1 = por %p674_p9, %p673_p5 }
 0x152   : > { %p676_p2 = pnand %p675_p1, %p669_p0 }
 0x1ad   : > { %v301_v10 = vpop.permute.xlu0 %300 }
 0x1ae   : > { %303 = vst.msk [vmem:[%s230_s29] sm:$0xf] %vm295_vm2, %v301_v10 }
 0x1af   : > { %679 = shalt.err (!%p676_p2)
}
 0x1b0   : > { %s680_s19 = scalar_lea.hbm %s991_s21, 64  ;;  %s684_s6 = scalar_lea.hbm %s1044_s3, 128 }
 0x1b1   : > { %p681_p7 = scmp.ne.s32.totalorder %s991_s21, %s680_s19  ;;  %p685_p13 = scmp.lt.u32.totalorder %s991_s21, %s1044_s3 }
 0x1b2   : > { %p686_p6 = scmp.lt.u32.totalorder %s684_s6, %s680_s19  ;;  %p688_p12 = scmp.lt.u32.totalorder %s680_s19, %s991_s21 }
 0x1b3   : > { %p682_p3 = pnand %p681_p7, %p883_p10 }
 0x1b4   : > { %p687_p8 = por %p686_p6, %p685_p13 }
 0x1b5   : > { %p683_p4 = pneg %p682_p3 }
 0x1b6   : > { %p689_p11 = por %p688_p12, %p687_p8 }
 0x1b8   : > { %p690_p0 = pnand %p689_p11, %p683_p4 }
 0x1ba   : > { %693 = shalt.err (!%p690_p0)
}
 0x1bb   : > { %502 = dma.vmem_to_hbm [thread:$0]  (%p883_p10), %s993_s26, 64, %s991_s21, %s310_s25  }
 0x1bc PF: > { %s350_s10 = sand.u32 1, %s736_s12   ;;  %p1062_p5 = scmp.ne.s32.totalorder %s1052_s23, 0 }
 0x1bd   : > { %p1063_p9 = scmp.ge.s32.totalorder %s756_s17, 2  ;;  %s351_s11 = scalar_lea.sflag [#allocation4], %s350_s10 }
 0x1bf   : > { %p514_p1 = pnand %p1063_p9, %p1062_p5 }
 0x1c1   : > { %727 = dma.done.wait (!%p514_p1), %s351_s11, 64  }
 0x1c2   : > { %729 = vsyncadd (!%p514_p1), %s351_s11, 4294967232  ;;  %s360_s29 = scalar_lea.sflag [#allocation9], %s350_s10 }
 0x1c3   : > { %731 = dma.done.wait (!%p514_p1), %s360_s29, 64  }
 0x1c4   : > { %733 = vsyncadd (!%p514_p1), %s360_s29, 4294967232  ;;  %s24_s17 = sadd.s32 1, %s756_s17   ;;  %s1064_s12 = smov %s740_s13 }
 0x1c5   : > { %p21_p2 = scmp.ge.s32.totalorder %s24_s17, 4   ;;  %s1065_s13 = smov %s744_s14 }
 0x1c6   : > { %s1066_s14 = smov %s892_s5  ;;  %s1067_s15 = smov %s752_s16 }
 0x1c7   : > { %s1068_s16 = smov %s1070_s28  ;;  %23 = sbr.rel (!%p21_p2) target bundleno = 9 (0x9), region = 94 }
 0x1ce   :  { %365 = vsyncpa [#allocation3], 1 }
 0x1cf   :  { %367 = vsyncpa [#allocation3 + $0x1], 1 }
 0x1d0   :  { %368 = vsyncpa [#allocation6], 1 }
 0x1d1   :  { %369 = vsyncpa [#allocation4], 1 }
 0x1d2   :  { %371 = vsyncpa [#allocation4 + $0x1], 1 }
 0x1d3   :  { %372 = vsyncpa [#allocation9], 1 }
 0x1d4   :  { %374 = vsyncpa [#allocation9 + $0x1], 1 }

</bundles_post_ra>
